<compile_context>
chip_gen: v7x
topology: tpu7x:2x2x1
jax: 0.10.0
libtpu: 0.0.40
codegen_flags: <defaults>
</compile_context>

<pallas_src>
import jax
import jax.numpy as jnp
from jax.experimental import pallas as pl
from jax.experimental.pallas import tpu as pltpu


def _round_up(x, m):
    return (x + m - 1) // m * m


def critic_kernel(s_ref, a_ref, w1s_ref, w1a_ref, b1_ref,
                  w2_ref, b2_ref, w3_ref, b3_ref, o_ref):
    # Fused torch.cat([s, a], 1):  h1 = W1_s @ s^T + W1_a @ a^T + b1   -> [H, tb]
    h1 = (jnp.dot(w1s_ref[...], s_ref[...], preferred_element_type=jnp.float32)
          + jnp.dot(w1a_ref[...], a_ref[...], preferred_element_type=jnp.float32)
          + b1_ref[...])
    h1 = jnp.maximum(h1, 0.0)

    h2 = jnp.dot(w2_ref[...], h1, preferred_element_type=jnp.float32) + b2_ref[...]
    h2 = jnp.maximum(h2, 0.0)                                          # [H, tb]

    # Lane-dense output block [out_size, tb].
    o_ref[...] = (jnp.dot(w3_ref[...], h2, preferred_element_type=jnp.float32)
                  + b3_ref[...]).astype(o_ref.dtype)


def critic_forward(s_t, a_t, params, *, block_b=8192):
    """Fused Critic forward.

    s_t: [state_dim, B], a_t: [action_dim, B]   (feature-major / batch-in-lanes)
    returns q: [B, output_size] float32 ==
        linear3(relu(linear2(relu(linear1(cat([s, a], 1)))))).
    """
    w1_s, w1_a, b1, w2, b2, w3, b3 = params
    B = s_t.shape[1]
    out_size = w3.shape[0]

    if B < 128:
        # Tiny-batch path: one block covering the full arrays (always legal).
        tb = B
    else:
        # Lane tile: multiple of 128, at most block_b, and small enough that
        # large batches give >= 2 grid steps (keeps both v7x TensorCores busy).
        tb = max(128, min(_round_up(block_b, 128),
                          _round_up(pl.cdiv(B, 2), 128)))
    grid = (pl.cdiv(B, tb),)

    def lane_spec(nrows):            # tiled over batch lanes, double-buffered
        return pl.BlockSpec((nrows, tb), lambda i: (0, i))

    def resident_spec(arr):          # constant block index -> stays in VMEM
        return pl.BlockSpec(arr.shape, lambda i: (0, 0))

    out_t = pl.pallas_call(
        critic_kernel,
        out_shape=jax.ShapeDtypeStruct((out_size, B), jnp.float32),
        grid=grid,
        in_specs=[lane_spec(s_t.shape[0]), lane_spec(a_t.shape[0]),
                  resident_spec(w1_s), resident_spec(w1_a), resident_spec(b1),
                  resident_spec(w2), resident_spec(b2),
                  resident_spec(w3), resident_spec(b3)],
        out_specs=pl.BlockSpec((out_size, tb), lambda i: (0, i)),
        compiler_params=pltpu.CompilerParams(
            dimension_semantics=("parallel",),
            vmem_limit_bytes=32 * 1024 * 1024),
    )(s_t, a_t, w1_s, w1_a, b1, w2, b2, w3, b3)

    if out_size == 1:
        return out_t.reshape(B, 1)   # free: identical contiguous bytes
    return out_t.T                   # tiny (out_size * B * 4 bytes)


def init_params(key, state_dim, action_dim, hidden_size, output_size):
    """nn.Linear-style init (U[-1/sqrt(fan_in), 1/sqrt(fan_in)]).

    Weights in PyTorch-native [out_features, in_features] layout; W1 pre-split
    column-wise into (state, action) parts; biases stored as [out, 1] columns.
    """
    input_size = state_dim + action_dim
    ks = jax.random.split(key, 6)

    def linear(kw, kb, fan_in, fan_out):
        bound = float(fan_in) ** -0.5
        w = jax.random.uniform(kw, (fan_out, fan_in), jnp.float32, -bound, bound)
        b = jax.random.uniform(kb, (fan_out, 1), jnp.float32, -bound, bound)
        return w, b

    w1, b1 = linear(ks[0], ks[1], input_size, hidden_size)
    w2, b2 = linear(ks[2], ks[3], hidden_size, hidden_size)
    w3, b3 = linear(ks[4], ks[5], hidden_size, output_size)
    w1_s, w1_a = w1[:, :state_dim], w1[:, state_dim:]
    return (w1_s, w1_a, b1, w2, b2, w3, b3)


def reference_forward(s, a, params):
    """Pure-JAX reference of the PyTorch Critic.forward (batch-major)."""
    w1_s, w1_a, b1, w2, b2, w3, b3 = params
    w1 = jnp.concatenate([w1_s, w1_a], axis=1)               # [H, input_size]
    x = jnp.concatenate([s, a], axis=1)                      # torch.cat([s, a], 1)
    h1 = jnp.maximum(jnp.dot(x, w1.T, preferred_element_type=jnp.float32) + b1[:, 0], 0.0)
    h2 = jnp.maximum(jnp.dot(h1, w2.T, preferred_element_type=jnp.float32) + b2[:, 0], 0.0)
    return jnp.dot(h2, w3.T, preferred_element_type=jnp.float32) + b3[:, 0]


if __name__ == "__main__":
    # Pendulum-v0 Critic: state_dim=3, action_dim=1 -> input_size=4; hidden=32; out=1
    state_dim, action_dim = 3, 1
    hidden_size, output_size = 32, 1

    key = jax.random.PRNGKey(0)
    k_s, k_a, k_p = jax.random.split(key, 3)
    params = init_params(k_p, state_dim, action_dim, hidden_size, output_size)

    # --- small batch (single full block path) ---
    batch = 8
    s = jax.random.normal(k_s, (batch, state_dim), jnp.float32)
    a = jax.random.normal(k_a, (batch, action_dim), jnp.float32)
    # Kernel consumes feature-major s/a (the layout a replay buffer should store).
    q = jax.block_until_ready(critic_forward(s.T, a.T, params))
    q_ref = reference_forward(s, a, params)
    assert q.shape == (batch, output_size)
    assert jnp.allclose(q, q_ref, atol=1e-4, rtol=1e-4), "small-batch mismatch vs reference"

    # --- larger batch (128-lane tiles + ragged last block, masked writeback) ---
    batch2 = 300
    s2 = jax.random.normal(k_s, (batch2, state_dim), jnp.float32)
    a2 = jax.random.normal(k_a, (batch2, action_dim), jnp.float32)
    q2 = jax.block_until_ready(critic_forward(s2.T, a2.T, params))
    q2_ref = reference_forward(s2, a2, params)
    assert q2.shape == (batch2, output_size)
    assert jnp.allclose(q2, q2_ref, atol=1e-4, rtol=1e-4), "tiled-batch mismatch vs reference"

    print("KERNEL_OK")
</pallas_src>

<mosaic_0001>
module attributes {stable_mosaic.version = 11 : i64} {
  func.func @critic_kernel(%arg0: i32, %arg1: memref<3x8xf32, #tpu.memory_space<vmem>>, %arg2: memref<1x8xf32, #tpu.memory_space<vmem>>, %arg3: memref<32x3xf32, #tpu.memory_space<vmem>>, %arg4: memref<32x1xf32, #tpu.memory_space<vmem>>, %arg5: memref<32x1xf32, #tpu.memory_space<vmem>>, %arg6: memref<32x32xf32, #tpu.memory_space<vmem>>, %arg7: memref<32x1xf32, #tpu.memory_space<vmem>>, %arg8: memref<1x32xf32, #tpu.memory_space<vmem>>, %arg9: memref<1x1xf32, #tpu.memory_space<vmem>>, %arg10: memref<1x8xf32, #tpu.memory_space<vmem>>) attributes {dimension_semantics = [#tpu.dimension_semantics<parallel>], iteration_bounds = array<i64: 1>, scalar_prefetch = 0 : i64, scratch_operands = 0 : i64, tpu.core_type = #tpu.core_type<tc>, window_params = [{transform_indices = @transform_0, window_bounds = array<i64: 3, 8>}, {transform_indices = @transform_1, window_bounds = array<i64: 1, 8>}, {pipeline_mode = #tpu.pipeline_mode<synchronous>, transform_indices = @transform_2, window_bounds = array<i64: 32, 3>}, {pipeline_mode = #tpu.pipeline_mode<synchronous>, transform_indices = @transform_3, window_bounds = array<i64: 32, 1>}, {pipeline_mode = #tpu.pipeline_mode<synchronous>, transform_indices = @transform_4, window_bounds = array<i64: 32, 1>}, {pipeline_mode = #tpu.pipeline_mode<synchronous>, transform_indices = @transform_5, window_bounds = array<i64: 32, 32>}, {pipeline_mode = #tpu.pipeline_mode<synchronous>, transform_indices = @transform_6, window_bounds = array<i64: 32, 1>}, {pipeline_mode = #tpu.pipeline_mode<synchronous>, transform_indices = @transform_7, window_bounds = array<i64: 1, 32>}, {pipeline_mode = #tpu.pipeline_mode<synchronous>, transform_indices = @transform_8, window_bounds = array<i64: 1, 1>}, {transform_indices = @transform_9, window_bounds = array<i64: 1, 8>}]} {
    %c0 = arith.constant 0 : index
    %c0_0 = arith.constant 0 : index
    %0 = vector.load %arg3[%c0, %c0_0] : memref<32x3xf32, #tpu.memory_space<vmem>>, vector<32x3xf32>
    %c0_1 = arith.constant 0 : index
    %c0_2 = arith.constant 0 : index
    %1 = vector.load %arg1[%c0_1, %c0_2] : memref<3x8xf32, #tpu.memory_space<vmem>>, vector<3x8xf32>
    %cst = arith.constant dense<0.000000e+00> : vector<32x8xf32>
    %2 = tpu.matmul %0, %1, %cst {dimension_numbers = #tpu.dot_dimension_numbers<[1], [0], [0], [1], [0, 0, 1, 1], [], []>} : vector<32x3xf32>, vector<3x8xf32>, vector<32x8xf32> -> vector<32x8xf32>
    %c0_3 = arith.constant 0 : index
    %c0_4 = arith.constant 0 : index
    %3 = vector.load %arg4[%c0_3, %c0_4] : memref<32x1xf32, #tpu.memory_space<vmem>>, vector<32x1xf32>
    %c0_5 = arith.constant 0 : index
    %c0_6 = arith.constant 0 : index
    %4 = vector.load %arg2[%c0_5, %c0_6] : memref<1x8xf32, #tpu.memory_space<vmem>>, vector<1x8xf32>
    %cst_7 = arith.constant dense<0.000000e+00> : vector<32x8xf32>
    %5 = tpu.matmul %3, %4, %cst_7 {dimension_numbers = #tpu.dot_dimension_numbers<[1], [0], [0], [1], [0, 0, 1, 1], [], []>} : vector<32x1xf32>, vector<1x8xf32>, vector<32x8xf32> -> vector<32x8xf32>
    %6 = arith.addf %2, %5 : vector<32x8xf32>
    %c0_8 = arith.constant 0 : index
    %c0_9 = arith.constant 0 : index
    %7 = vector.load %arg5[%c0_8, %c0_9] : memref<32x1xf32, #tpu.memory_space<vmem>>, vector<32x1xf32>
    %8 = vector.broadcast %7 : vector<32x1xf32> to vector<32x8xf32>
    %9 = arith.addf %6, %8 : vector<32x8xf32>
    %cst_10 = arith.constant 0.000000e+00 : f32
    %10 = vector.broadcast %cst_10 : f32 to vector<32x8xf32>
    %11 = arith.maximumf %9, %10 : vector<32x8xf32>
    %c0_11 = arith.constant 0 : index
    %c0_12 = arith.constant 0 : index
    %12 = vector.load %arg6[%c0_11, %c0_12] : memref<32x32xf32, #tpu.memory_space<vmem>>, vector<32x32xf32>
    %cst_13 = arith.constant dense<0.000000e+00> : vector<32x8xf32>
    %13 = tpu.matmul %12, %11, %cst_13 {dimension_numbers = #tpu.dot_dimension_numbers<[1], [0], [0], [1], [0, 0, 1, 1], [], []>} : vector<32x32xf32>, vector<32x8xf32>, vector<32x8xf32> -> vector<32x8xf32>
    %c0_14 = arith.constant 0 : index
    %c0_15 = arith.constant 0 : index
    %14 = vector.load %arg7[%c0_14, %c0_15] : memref<32x1xf32, #tpu.memory_space<vmem>>, vector<32x1xf32>
    %15 = vector.broadcast %14 : vector<32x1xf32> to vector<32x8xf32>
    %16 = arith.addf %13, %15 : vector<32x8xf32>
    %cst_16 = arith.constant 0.000000e+00 : f32
    %17 = vector.broadcast %cst_16 : f32 to vector<32x8xf32>
    %18 = arith.maximumf %16, %17 : vector<32x8xf32>
    %c0_17 = arith.constant 0 : index
    %c0_18 = arith.constant 0 : index
    %19 = vector.load %arg8[%c0_17, %c0_18] : memref<1x32xf32, #tpu.memory_space<vmem>>, vector<1x32xf32>
    %cst_19 = arith.constant dense<0.000000e+00> : vector<1x8xf32>
    %20 = tpu.matmul %19, %18, %cst_19 {dimension_numbers = #tpu.dot_dimension_numbers<[1], [0], [0], [1], [0, 0, 1, 1], [], []>} : vector<1x32xf32>, vector<32x8xf32>, vector<1x8xf32> -> vector<1x8xf32>
    %c0_20 = arith.constant 0 : index
    %c0_21 = arith.constant 0 : index
    %21 = vector.load %arg9[%c0_20, %c0_21] : memref<1x1xf32, #tpu.memory_space<vmem>>, vector<1x1xf32>
    %22 = vector.broadcast %21 : vector<1x1xf32> to vector<1x8xf32>
    %23 = arith.addf %20, %22 : vector<1x8xf32>
    %c0_22 = arith.constant 0 : index
    %c0_23 = arith.constant 0 : index
    %24 = vector.load %arg10[%c0_22, %c0_23] : memref<1x8xf32, #tpu.memory_space<vmem>>, vector<1x8xf32>
    tpu.vector_store %arg10[%c0_22, %c0_23], %23 {strides = array<i32>} : memref<1x8xf32, #tpu.memory_space<vmem>>, vector<1x8xf32>,
    return
  }
  func.func @transform_0(%arg0: i32) -> (i32, i32) {
    %c0_i32 = arith.constant 0 : i32
    %c0_i32_0 = arith.constant 0 : i32
    return %c0_i32, %arg0 : i32, i32
  }
  func.func @transform_1(%arg0: i32) -> (i32, i32) {
    %c0_i32 = arith.constant 0 : i32
    %c0_i32_0 = arith.constant 0 : i32
    return %c0_i32, %arg0 : i32, i32
  }
  func.func @transform_2(%arg0: i32) -> (i32, i32) {
    %c0_i32 = arith.constant 0 : i32
    %c0_i32_0 = arith.constant 0 : i32
    %c0_i32_1 = arith.constant 0 : i32
    return %c0_i32, %c0_i32_0 : i32, i32
  }
  func.func @transform_3(%arg0: i32) -> (i32, i32) {
    %c0_i32 = arith.constant 0 : i32
    %c0_i32_0 = arith.constant 0 : i32
    %c0_i32_1 = arith.constant 0 : i32
    return %c0_i32, %c0_i32_0 : i32, i32
  }
  func.func @transform_4(%arg0: i32) -> (i32, i32) {
    %c0_i32 = arith.constant 0 : i32
    %c0_i32_0 = arith.constant 0 : i32
    %c0_i32_1 = arith.constant 0 : i32
    return %c0_i32, %c0_i32_0 : i32, i32
  }
  func.func @transform_5(%arg0: i32) -> (i32, i32) {
    %c0_i32 = arith.constant 0 : i32
    %c0_i32_0 = arith.constant 0 : i32
    %c0_i32_1 = arith.constant 0 : i32
    return %c0_i32, %c0_i32_0 : i32, i32
  }
  func.func @transform_6(%arg0: i32) -> (i32, i32) {
    %c0_i32 = arith.constant 0 : i32
    %c0_i32_0 = arith.constant 0 : i32
    %c0_i32_1 = arith.constant 0 : i32
    return %c0_i32, %c0_i32_0 : i32, i32
  }
  func.func @transform_7(%arg0: i32) -> (i32, i32) {
    %c0_i32 = arith.constant 0 : i32
    %c0_i32_0 = arith.constant 0 : i32
    %c0_i32_1 = arith.constant 0 : i32
    return %c0_i32, %c0_i32_0 : i32, i32
  }
  func.func @transform_8(%arg0: i32) -> (i32, i32) {
    %c0_i32 = arith.constant 0 : i32
    %c0_i32_0 = arith.constant 0 : i32
    %c0_i32_1 = arith.constant 0 : i32
    return %c0_i32, %c0_i32_0 : i32, i32
  }
  func.func @transform_9(%arg0: i32) -> (i32, i32) {
    %c0_i32 = arith.constant 0 : i32
    %c0_i32_0 = arith.constant 0 : i32
    return %c0_i32, %arg0 : i32, i32
  }
}

</mosaic_0001>

<bundles_post_ra>
// kernel: tpu_custom_call.1
= control target key start
LH: loop header
LB: loop body
LE: loop exit
PB: predicated region body
PF: predicated region fallthrough
CT: control target
= control target key end

     0   :  { %s791_s0 = inlined_call_operand.vmem [shape: f32[3,8], index: 0, kind: input, shape index: {}]   ;;  %s792_s1 = inlined_call_operand.vmem [shape: f32[1,8], index: 1, kind: input, shape index: {}]   ;;  %s793_s2 = inlined_call_operand.vmem [shape: f32[32,3], index: 2, kind: input, shape index: {}]   ;;  %s794_s3 = inlined_call_operand.vmem [shape: f32[32,1], index: 3, kind: input, shape index: {}]   ;;  %s795_s4 = inlined_call_operand.vmem [shape: f32[32,1], index: 4, kind: input, shape index: {}]   ;;  %s796_s5 = inlined_call_operand.vmem [shape: f32[32,32], index: 5, kind: input, shape index: {}]   ;;  %s797_s6 = inlined_call_operand.vmem [shape: f32[32,1], index: 6, kind: input, shape index: {}]   ;;  %s798_s7 = inlined_call_operand.vmem [shape: f32[1,32], index: 7, kind: input, shape index: {}]   ;;  %s799_s8 = inlined_call_operand.<no memory space> [shape: f32[1,1], index: 8, kind: input, shape index: {}]   ;;  %s800_s9 = inlined_call_operand.hbm [shape: f32[1,8], index: 9, kind: output, shape index: {}]  }
   0x1   :  { %v14_v0 = vstv %s799_s8 }
   0x2   :  { %15 = vst [vmem:[#allocation2] sm:$0x1] %v14_v0 }
   0x3   :  { %v44_v1 = vld [vmem:[%s792_s1] sm:$0x1]  ;;  %vm58_vm0 = vcmask 1040384   ;;  %vm45_vm1 = vcmask 7168   ;;  %v41_v3 = vld [vmem:[%s794_s3 + $0x8] sm:$0xff]  ;;  %vm160_vm2 = vcmask 1042432  }
   0x4   :  { %v40_v2 = vld [vmem:[%s794_s3] sm:$0xff]  ;;  %549 = vmatprep.subr.msk.mxu0 %vm58_vm0, %v44_v1  ;;  %v42_v5 = vld [vmem:[%s794_s3 + $0x10] sm:$0xff]  ;;  %v43_v7 = vld [vmem:[%s794_s3 + $0x18] sm:$0xff]  ;;  %vm147_vm3 = vcmask 23552   ;;  %v639_v10 = vmov 0  }
   0x5   :  { %551 = vmatprep.mubr.msk.f32.mxu0 %vm45_vm1, %v40_v2  ;;  %v39_v4 = vld [vmem:[%s791_s0] sm:$0x7]  ;;  %550 = vmatpush3.msk.msra.mxu0 %vm58_vm0, %v44_v1  ;;  %v251_v8 = vld [vmem:[%s795_s4 + $0x10] sm:$0xff] }
   0x6   :  { %552 = vmatmul.mubr.msk.f32.vlgmr.msra.gmra.mrb[0].mxu0 %vm45_vm1, %v41_v3  ;;  %557 = vmatprep.subr.msk.mxu0 %vm160_vm2, %v39_v4  ;;  %v249_v6 = vld [vmem:[%s795_s4] sm:$0xff] }
   0x7   :  { %558 = vmatpush3.msk.msra.mxu0 %vm160_vm2, %v39_v4  ;;  %554 = vmatprep.mubr.msk.f32.mxu0 %vm45_vm1, %v42_v5  ;;  %v35_v9 = vld [vmem:[%s793_s2] sm:$0xff] }
   0x8   :  { %613 = vset.pattern.permute.xlu0 %v639_v10  ;;  %614 = vset.pattern.permute.xlu1 %v639_v10 }
   0x9   :  { %255 = vperm.xlu0 %613, %v249_v6   ;;  %265 = vperm.xlu1 %614, %v251_v8  }
   0xa   :  { %16 = vsyncpa [#allocation4], 0  ;;  %555 = vmatmul.mubr.msk.f32.gmra.mrb[2].mxu0 %vm45_vm1, %v43_v7  ;;  %v250_v11 = vld [vmem:[%s795_s4 + $0x8] sm:$0xff]  ;;  %v252_v12 = vld [vmem:[%s795_s4 + $0x18] sm:$0xff]  ;;  %vm309_vm4 = vcmask 261120   ;;  %v640_v43 = vmov 0.0|0.0   ;;  %v418_v0 = vlaneseq }
   0xb   :  { %559 = vmatprep.mubr.msk.f32.mxu0 %vm147_vm3, %v35_v9  ;;  %v36_v13 = vld [vmem:[%s793_s2 + $0x8] sm:$0xff]  ;;  %v37_v14 = vld [vmem:[%s793_s2 + $0x10] sm:$0xff]  ;;  %v285_v15 = vld [vmem:[%s797_s6] sm:$0xff]  ;;  %vm641_vm5 = vmmov 0   ;;  %v642_v44 = vmov 0.0   ;;  %s643_s25 = smov [#allocation3]  }
   0xc   :  { %v286_v16 = vld [vmem:[%s797_s6 + $0x8] sm:$0xff]  ;;  %v38_v17 = vld [vmem:[%s793_s2 + $0x18] sm:$0xff]  ;;  %v287_v18 = vld [vmem:[%s797_s6 + $0x10] sm:$0xff]  ;;  %v419_v1 = vshrl.u32 %v418_v0, 7  ;;  %s503_s26 = sshll.u32 %s643_s25, 4  ;;  %vm495_vm6 = vcmask 57344   ;;  %s504_s26 = int_to_ptr.vmem [resolvable:$true] %s503_s26 }
   0xd   :  { %260 = vperm.xlu0 %613, %v250_v11   ;;  %270 = vperm.xlu1 %614, %v252_v12   ;;  %v288_v19 = vld [vmem:[%s797_s6 + $0x18] sm:$0xff]  ;;  %v412_v20 = vld [vmem:[#allocation2] sm:$0x1]  ;;  %v282_v40 = vld [vmem:[%s796_s5 + $0x8] sm:$0xff]  ;;  %s615_s27 = scalar_lea.vmem %s504_s26, 16  ;;  %s619_s3 = scalar_lea.vmem %s504_s26, 32 }
   0xe   :  { %560 = vmatmul.mubr.msk.f32.vlgmr.msra.gmra.mrb[0].mxu0 %vm147_vm3, %v36_v13  ;;  %v281_v21 = vld [vmem:[%s796_s5] sm:$0xff]  ;;  %v283_v41 = vld [vmem:[%s796_s5 + $0x10] sm:$0xff]  ;;  %v284_v42 = vld [vmem:[%s796_s5 + $0x18] sm:$0xff]  ;;  %v420_v2 = vsub.s32 0, %v419_v1  ;;  %p616_p0 = scmp.ne.s32.totalorder %s504_s26, %s615_s27  ;;  %p620_p1 = scmp.lt.s32.totalorder %s504_s26, %s504_s26 }
   0xf   :  { %562 = vmatprep.mubr.msk.f32.mxu0 %vm147_vm3, %v37_v14  ;;  %573 = vmatprep.mubr.msk.f32.mxu1 %vm309_vm4, %v281_v21  ;;  %v411_v63 = vld [vmem:[%s798_s7] sm:$0x1]  ;;  %p621_p2 = scmp.lt.s32.totalorder %s619_s3, %s615_s27 }
  0x11   :  { %291 = vperm.xlu0 %613, %v285_v15   ;;  %296 = vperm.xlu1 %614, %v286_v16   ;;  %p622_p3 = por %p621_p2, %p620_p1 }
  0x12   :  { %563 = vmatmul.mubr.msk.f32.gmra.mrb[2].mxu0 %vm147_vm3, %v38_v17 }
  0x13   :  { %p623_p4 = pnand %p622_p3, %p616_p0 }
  0x15   :  { %301 = vperm.xlu0 %613, %v287_v18   ;;  %306 = vperm.xlu1 %614, %v288_v19  }
  0x19   :  { %415 = vperm.xlu0 %613, %v412_v20  }
  0x88   :  { %v256_v22 = vpop.permute.xlu0 %255  ;;  %v266_v23 = vpop.permute.xlu1 %265 }
  0x8c   :  { %v261_v24 = vpop.permute.xlu0 %260  ;;  %v271_v30 = vpop.permute.xlu1 %270 }
  0x90   :  { %v297_v45 = vpop.permute.xlu1 %296  ;;  %v292_v46 = vpop.permute.xlu0 %291 }
  0x94   :  { %v307_v52 = vpop.permute.xlu1 %306  ;;  %v302_v55 = vpop.permute.xlu0 %301 }
  0x98   :  { %v416_v3 = vpop.permute.xlu0 %415 }
  0x99   :  { %v421_v4 = vrot.slane %v416_v3, %v420_v2 }
  0xe1   :  { %v561_v25 = vpop.f32.mrb[0].mxu0 }
  0xe2   :  { %v274_v26 = vadd.f32 %v561_v25, %v261_v24  ;;  %v230_v27 = vpop.f32.mrb[1].mxu0 }
  0xe3   :  { %v273_v28 = vadd.f32 %v256_v22, %v230_v27 }
  0xe4   :  { %v278_v29 = vmax.f32 %v274_v26, 0.0 }
  0xe5   :  { %v277_v31 = vmax.f32 %v273_v28, 0.0  ;;  %v564_v32 = vpop.f32.mrb[2].mxu0 }
  0xe6   :  { %v276_v33 = vadd.f32 %v564_v32, %v271_v30  ;;  %v240_v34 = vpop.f32.mrb[3].mxu0 }
  0xe7   :  { %v275_v35 = vadd.f32 %v266_v23, %v240_v34  ;;  %v590_v36 = vpack.c.bf16 %v278_v29, %v277_v31 }
  0xe8   :  { %v280_v37 = vmax.f32 %v276_v33, 0.0 }
  0xe9   :  { %v279_v38 = vmax.f32 %v275_v35, 0.0  ;;  %591 = vmatprep.subr.bf16.mxu1 %v590_v36 }
  0xea   :  { %593 = vmatpush3.bf16.msra.mxu1 %v590_v36 }
  0xeb   :  { %v594_v39 = vpack.c.bf16 %v280_v37, %v279_v38 }
  0xed   :  { %595 = vmatprep.subr.bf16.mxu1 %v594_v39 }
  0xee   :  { %597 = vmatpush3.bf16.msra.mxu1 %v594_v39 }
  0xef   :  { %598 = vmatprep.subr.bf16.mxu1 %v640_v43 }
  0xf1   :  { %574 = vmatmul.mubr.msk.f32.vlgmr.msra.gmra.mrb[0].mxu1 %vm309_vm4, %v282_v40 }
  0xf2   :  { %576 = vmatprep.mubr.msk.f32.mxu1 %vm309_vm4, %v283_v41 }
  0xf5   :  { %577 = vmatmul.mubr.msk.f32.gmra.mrb[2].mxu1 %vm309_vm4, %v284_v42 }
  0xf6   :  { %587 = vmatprep.mubr.msk.f32.mxu1 %vm641_vm5, %v642_v44 }
 0x1c4   :  { %v575_v47 = vpop.f32.mrb[0].mxu1 }
 0x1c5   :  { %v394_v48 = vadd.f32 %v575_v47, %v297_v45  ;;  %v388_v49 = vpop.f32.mrb[1].mxu1 }
 0x1c6   :  { %v389_v50 = vadd.f32 %v388_v49, %v292_v46 }
 0x1c7   :  { %v408_v51 = vmax.f32 %v394_v48, 0.0 }
 0x1c8   :  { %v407_v53 = vmax.f32 %v389_v50, 0.0  ;;  %v578_v54 = vpop.f32.mrb[2].mxu1 }
 0x1c9   :  { %v404_v56 = vadd.f32 %v578_v54, %v307_v52  ;;  %v398_v57 = vpop.f32.mrb[3].mxu1 }
 0x1ca   :  { %v599_v58 = vpack.c.bf16 %v408_v51, %v407_v53  ;;  %v399_v59 = vadd.f32 %v398_v57, %v302_v55 }
 0x1cb   :  { %v410_v60 = vmax.f32 %v404_v56, 0.0 }
 0x1cc   :  { %v409_v61 = vmax.f32 %v399_v59, 0.0  ;;  %600 = vmatpush3.bf16.msra.mxu1 %v599_v58 }
 0x1cd   :  { %601 = vmatprep.subr.bf16.mxu1 %v640_v43 }
 0x1ce   :  { %v602_v62 = vpack.c.bf16 %v410_v60, %v409_v61 }
 0x1d0   :  { %603 = vmatpush3.bf16.msra.mxu1 %v602_v62 }
 0x1d3   :  { %588 = vmatmul.mubr.msk.f32.vlgmr.msra.gmra.mrb[4].mxu1 %vm309_vm4, %v411_v63 }
 0x2a6   :  { %v491_v5 = vpop.f32.mrb[4].mxu1 }
 0x2a7   :  { %v492_v6 = vadd.f32 %v491_v5, %v421_v4  ;;  %v589_v7 = vpop.f32.mrb[5].mxu1 }
 0x2a9   :  { %496 = vst.msk [vmem:[#allocation3] sm:$0x1] %vm495_vm6, %v492_v6 }
 0x2aa   :  { %626 = shalt.err (!%p623_p4)
}
 0x2ab   :  { %s627_s29 = scalar_lea.hbm %s800_s9, 16 }
 0x2ac   :  { %p628_p5 = scmp.ne.s32.totalorder %s800_s9, %s627_s29  ;;  %p631_p6 = scmp.lt.u32.totalorder %s627_s29, %s800_s9 }
 0x2ae   :  { %p633_p7 = pnand %p631_p6, %p628_p5 }
 0x2b0   :  { %636 = shalt.err (!%p633_p7)
}
 0x2b1   :  { %506 = dma.vmem_to_hbm [thread:$0]  %s504_s26, 16, %s800_s9, [#allocation4]  }
 0x2b2   :  { %637 = dma.done.wait [#allocation4], 16  }
 0x2b3   :  { %638 = vsyncadd [#allocation4], 4294967280 }
 0x2b4   :  { %510 = vsyncpa [#allocation4], 1 }

</bundles_post_ra>
